<compile_context>
chip_gen: v7x
topology: tpu7x:2x2x1
jax: 0.10.0
libtpu: 0.0.40
codegen_flags: <defaults>
</compile_context>

<pallas_src>
import functools

import jax
import jax.numpy as jnp
from jax import lax
from jax.experimental import pallas as pl
from jax.experimental.pallas import tpu as pltpu


def _dice_kernel(p_ref, t_ref, num_ref, den_ref, num_acc, den_acc, *,
                 p_exp, f_total, tile_f, tiles_per_split, mask_possible):
    # Grid axes: 0 = batch block ("parallel"), 1 = feature split ("parallel"),
    # 2 = feature tile (reduction, innermost, "arbitrary").
    s = pl.program_id(1)
    k = pl.program_id(2)

    @pl.when(k == 0)
    def _():
        num_acc[...] = jnp.zeros_like(num_acc)
        den_acc[...] = jnp.zeros_like(den_acc)

    pr = p_ref[...].astype(jnp.float32)
    tg = t_ref[...].astype(jnp.float32)

    def accumulate(pr, tg):
        # num partial: sum(pr * tg)
        num_acc[...] += jnp.sum(pr * tg, axis=1, keepdims=True)
        if p_exp == 2:
            # pr^2 + tg^2 = (pr + tg)^2 - 2*pr*tg ; the -2*num correction is
            # applied once at finalize (saves one VALU op per element here).
            ssum = pr + tg
            den_acc[...] += jnp.sum(ssum * ssum, axis=1, keepdims=True)
        elif p_exp == 1:
            den_acc[...] += jnp.sum(pr + tg, axis=1, keepdims=True)
        elif isinstance(p_exp, int):
            # Integer powers stay on the VALU (jnp.power would route exp/log
            # through the single EUP and make the kernel compute-bound).
            den_acc[...] += jnp.sum(
                lax.integer_pow(pr, p_exp) + lax.integer_pow(tg, p_exp),
                axis=1, keepdims=True)
        else:
            den_acc[...] += jnp.sum(
                jnp.power(pr, p_exp) + jnp.power(tg, p_exp),
                axis=1, keepdims=True)

    global_tile = s * tiles_per_split + k

    if mask_possible:
        # Only boundary tiles (ragged tail of F, or the phantom tiles created
        # by an odd feature split) pay for the mask; steady-state tiles take
        # the unmasked path.  The cold branch is skipped at runtime.
        at_boundary = (global_tile + 1) * tile_f > f_total

        @pl.when(jnp.logical_not(at_boundary))
        def _():
            accumulate(pr, tg)

        @pl.when(at_boundary)
        def _():
            lane = lax.broadcasted_iota(jnp.int32, pr.shape, 1)
            valid = (global_tile * tile_f + lane) < f_total
            accumulate(jnp.where(valid, pr, 0.0), jnp.where(valid, tg, 0.0))
    else:
        accumulate(pr, tg)

    @pl.when(k == pl.num_programs(2) - 1)
    def _():
        num_ref[...] = num_acc[...]
        if p_exp == 2:
            den_ref[...] = den_acc[...] - 2.0 * num_acc[...]
        else:
            den_ref[...] = den_acc[...]


# 2 inputs x 2 pipeline buffers of the feature tile must fit this budget.
# 8 MiB is inside every generation's default scoped VMEM (v5e 16 MiB,
# v6e/v7x 32 MiB) and any tile >= ~512 lanes already saturates HBM.
# TODO(synk): optionally raise to ~16 MiB on v5e/v6e only (128 MiB physical)
# via a hardware query; expected win is small (already near the HBM roofline).
_INPUT_BUFFER_BUDGET_BYTES = 8 * 1024 * 1024


def binary_dice_loss(predict, target, smooth=1.0, p=2, reduction="mean",
                     max_tile_f=None):
    assert predict.shape[0] == target.shape[0], \
        "predict & target batch size don't match"
    n = predict.shape[0]

    # Flatten to [N, F]; keep producer dtype (no HBM upcast).
    pred2d = predict.reshape(n, -1)
    targ2d = target.reshape(n, -1)
    f = pred2d.shape[1]

    itemsize_p = jnp.dtype(pred2d.dtype).itemsize
    itemsize_t = jnp.dtype(targ2d.dtype).itemsize
    itemsize = max(itemsize_p, itemsize_t)

    # Dtype-aware batch block: sub-32-bit dtypes pack along sublanes, so a
    # full vreg is 8 rows (f32), 16 rows (bf16), 32 rows (int8/fp8).
    pack = max(1, 4 // itemsize)
    row_cap = 8 * pack
    bn = row_cap if n > row_cap else n
    n_batch_blocks = pl.cdiv(n, bn)

    # Feature tile sized to the double-buffered VMEM budget, multiple of 128,
    # capped at the (128-rounded) feature extent.
    per_buffer = _INPUT_BUFFER_BUDGET_BYTES // 4
    tile_f = per_buffer // (row_cap * itemsize)
    tile_f = max(128, (tile_f // 128) * 128)
    f_ceil = ((f + 127) // 128) * 128
    tile_f = min(tile_f, f_ceil)
    if max_tile_f is not None:
        tile_f = min(tile_f, max(128, (int(max_tile_f) // 128) * 128))
    n_tiles = pl.cdiv(f, tile_f)

    # Small-N case: split the feature range into 2 parallel halves so both
    # v7x TensorCores get work (no-op cost on 1-TC v5e/v6e).
    n_splits = 2 if (n_batch_blocks == 1 and n_tiles >= 2) else 1
    tiles_per_split = pl.cdiv(n_tiles, n_splits)
    mask_possible = (f % tile_f != 0) or (n_splits * tiles_per_split != n_tiles)
    last_tile = n_tiles - 1

    def in_map(i, s, k):
        # Clamp phantom tiles (odd split) to a valid block; the in-kernel mask
        # zeroes their contribution.
        return (i, jnp.minimum(s * tiles_per_split + k, last_tile))

    def out_map(i, s, k):
        return (s, i, 0)

    kernel = functools.partial(
        _dice_kernel, p_exp=p, f_total=f, tile_f=tile_f,
        tiles_per_split=tiles_per_split, mask_possible=mask_possible)

    cost = pl.CostEstimate(
        flops=5 * n * f,
        transcendentals=0,
        bytes_accessed=n * f * (itemsize_p + itemsize_t)
        + 2 * n_splits * n * 4,
    )

    num_out, den_out = pl.pallas_call(
        kernel,
        out_shape=(jax.ShapeDtypeStruct((n_splits, n, 1), jnp.float32),
                   jax.ShapeDtypeStruct((n_splits, n, 1), jnp.float32)),
        grid_spec=pltpu.PrefetchScalarGridSpec(
            num_scalar_prefetch=0,
            grid=(n_batch_blocks, n_splits, tiles_per_split),
            in_specs=[
                pl.BlockSpec((bn, tile_f), in_map),
                pl.BlockSpec((bn, tile_f), in_map),
            ],
            out_specs=[
                pl.BlockSpec((None, bn, 1), out_map),
                pl.BlockSpec((None, bn, 1), out_map),
            ],
            scratch_shapes=[
                pltpu.VMEM((bn, 1), jnp.float32),
                pltpu.VMEM((bn, 1), jnp.float32),
            ],
        ),
        compiler_params=pltpu.CompilerParams(
            dimension_semantics=("parallel", "parallel", "arbitrary"),
            vmem_limit_bytes=32 * 1024 * 1024,
        ),
        cost_estimate=cost,
    )(pred2d, targ2d)

    # Cheap finalize in plain-JAX glue (also merges the two feature splits).
    num = jnp.sum(num_out[:, :, 0], axis=0)   # [N]
    den = jnp.sum(den_out[:, :, 0], axis=0)   # [N]
    loss = 1.0 - (2.0 * num + float(smooth)) / (den + float(smooth))

    if reduction == "mean":
        return jnp.mean(loss)
    elif reduction == "sum":
        return jnp.sum(loss)
    elif reduction == "none":
        return loss
    else:
        raise Exception("Unexpected reduction {}".format(reduction))


def _reference_dice_loss(predict, target, smooth=1.0, p=2, reduction="mean"):
    n = predict.shape[0]
    pr = predict.reshape(n, -1).astype(jnp.float32)
    tg = target.reshape(n, -1).astype(jnp.float32)
    num = 2.0 * jnp.sum(pr * tg, axis=1) + smooth
    den = jnp.sum(jnp.power(pr, p) + jnp.power(tg, p), axis=1) + smooth
    loss = 1.0 - num / den
    if reduction == "mean":
        return jnp.mean(loss)
    elif reduction == "sum":
        return jnp.sum(loss)
    return loss


if __name__ == "__main__":
    key = jax.random.PRNGKey(0)
    k1, k2, k3, k4 = jax.random.split(key, 4)

    # 1) Main test: [N, C, H, W] = [2, 4, 16, 16], f32, 'mean' reduction.
    N, C, H, W = 2, 4, 16, 16
    predict = jax.nn.sigmoid(jax.random.normal(k1, (N, C, H, W), jnp.float32))
    target = (jax.random.uniform(k2, (N, C, H, W)) > 0.5).astype(jnp.float32)

    out = binary_dice_loss(predict, target, smooth=1.0, p=2, reduction="mean")
    out = jax.block_until_ready(out)
    ref = _reference_dice_loss(predict, target, 1.0, 2, "mean")
    assert jnp.allclose(out, ref, atol=1e-5, rtol=1e-5), (out, ref)

    # 2) Ragged feature axis (F=300) + forced small tile -> feature-split
    #    parallel path (n_splits=2), phantom-tile clamp and runtime-gated
    #    boundary mask, no jnp.pad.
    p2 = jax.nn.sigmoid(jax.random.normal(k3, (2, 3, 10, 10), jnp.float32))
    t2 = (jax.random.uniform(k4, (2, 3, 10, 10)) > 0.5).astype(jnp.float32)
    out2 = jax.block_until_ready(
        binary_dice_loss(p2, t2, smooth=1.0, p=2, reduction="none",
                         max_tile_f=128))
    ref2 = _reference_dice_loss(p2, t2, 1.0, 2, "none")
    assert jnp.allclose(out2, ref2, atol=1e-5, rtol=1e-5), (out2, ref2)

    # 3) bf16 inputs (N=16 -> dtype-aware bn=16, full sublane packing),
    #    streamed without an HBM upcast, 'sum' reduction.
    p3 = jax.nn.sigmoid(
        jax.random.normal(k1, (16, 1, 8, 16), jnp.float32)).astype(jnp.bfloat16)
    t3 = (jax.random.uniform(k2, (16, 1, 8, 16)) > 0.5).astype(jnp.bfloat16)
    out3 = jax.block_until_ready(
        binary_dice_loss(p3, t3, smooth=1.0, p=2, reduction="sum"))
    ref3 = _reference_dice_loss(p3, t3, 1.0, 2, "sum")
    assert jnp.allclose(out3, ref3, atol=5e-2, rtol=5e-2), (out3, ref3)

    # 4) Larger batch with a partial trailing batch block (N=10, bn=8 -> 2
    #    blocks on the parallel batch axis), 'mean' reduction.
    p4 = jax.nn.sigmoid(jax.random.normal(k3, (10, 2, 16, 16), jnp.float32))
    t4 = (jax.random.uniform(k4, (10, 2, 16, 16)) > 0.5).astype(jnp.float32)
    out4 = jax.block_until_ready(
        binary_dice_loss(p4, t4, smooth=1.0, p=2, reduction="mean"))
    ref4 = _reference_dice_loss(p4, t4, 1.0, 2, "mean")
    assert jnp.allclose(out4, ref4, atol=1e-5, rtol=1e-5), (out4, ref4)

    print("KERNEL_OK")
</pallas_src>

<mosaic_0001>
module attributes {stable_mosaic.version = 11 : i64} {
  func.func @_dice_kernel(%arg0: i32, %arg1: i32, %arg2: i32, %arg3: memref<2x1024xf32, #tpu.memory_space<vmem>>, %arg4: memref<2x1024xf32, #tpu.memory_space<vmem>>, %arg5: memref<1x2x1xf32, #tpu.memory_space<vmem>>, %arg6: memref<1x2x1xf32, #tpu.memory_space<vmem>>, %arg7: memref<2x1xf32, #tpu.memory_space<vmem>>, %arg8: memref<2x1xf32, #tpu.memory_space<vmem>>) attributes {dimension_semantics = [#tpu.dimension_semantics<parallel>, #tpu.dimension_semantics<parallel>, #tpu.dimension_semantics<arbitrary>], iteration_bounds = array<i64: 1, 1, 1>, scalar_prefetch = 0 : i64, scratch_operands = 2 : i64, tpu.core_type = #tpu.core_type<tc>, window_params = [{transform_indices = @transform_0, window_bounds = array<i64: 2, 1024>}, {transform_indices = @transform_1, window_bounds = array<i64: 2, 1024>}, {transform_indices = @transform_2, window_bounds = array<i64: 1, 2, 1>}, {transform_indices = @transform_3, window_bounds = array<i64: 1, 2, 1>}]} {
    %c0_i32 = arith.constant 0 : i32
    %0 = arith.cmpi eq, %arg2, %c0_i32 : i32
    %1 = arith.extui %0 : i1 to i32
    %c0_i32_0 = arith.constant 0 : i32
    %2 = arith.cmpi ne, %1, %c0_i32_0 : i32
    scf.if %2 {
      %cst_15 = arith.constant 0.000000e+00 : f32
      %21 = vector.broadcast %cst_15 : f32 to vector<2x1xf32>
      %c0_16 = arith.constant 0 : index
      %c0_17 = arith.constant 0 : index
      %22 = vector.load %arg7[%c0_16, %c0_17] : memref<2x1xf32, #tpu.memory_space<vmem>>, vector<2x1xf32>
      tpu.vector_store %arg7[%c0_16, %c0_17], %21 {strides = array<i32>} : memref<2x1xf32, #tpu.memory_space<vmem>>, vector<2x1xf32>,
      %cst_18 = arith.constant 0.000000e+00 : f32
      %23 = vector.broadcast %cst_18 : f32 to vector<2x1xf32>
      %c0_19 = arith.constant 0 : index
      %c0_20 = arith.constant 0 : index
      %24 = vector.load %arg8[%c0_19, %c0_20] : memref<2x1xf32, #tpu.memory_space<vmem>>, vector<2x1xf32>
      tpu.vector_store %arg8[%c0_19, %c0_20], %23 {strides = array<i32>} : memref<2x1xf32, #tpu.memory_space<vmem>>, vector<2x1xf32>,
    } else {
    }
    %c0 = arith.constant 0 : index
    %c0_1 = arith.constant 0 : index
    %3 = vector.load %arg3[%c0, %c0_1] : memref<2x1024xf32, #tpu.memory_space<vmem>>, vector<2x1024xf32>
    %c0_2 = arith.constant 0 : index
    %c0_3 = arith.constant 0 : index
    %4 = vector.load %arg4[%c0_2, %c0_3] : memref<2x1024xf32, #tpu.memory_space<vmem>>, vector<2x1024xf32>
    %c0_4 = arith.constant 0 : index
    %c0_5 = arith.constant 0 : index
    %5 = vector.load %arg7[%c0_4, %c0_5] : memref<2x1xf32, #tpu.memory_space<vmem>>, vector<2x1xf32>
    %6 = arith.mulf %3, %4 : vector<2x1024xf32>
    %cst = arith.constant dense<0.000000e+00> : vector<2xf32>
    %7 = vector.multi_reduction <add>, %6, %cst [1] : vector<2x1024xf32> to vector<2xf32>
    %8 = vector.shape_cast %7 : vector<2xf32> to vector<2x1xf32>
    %9 = arith.addf %5, %8 : vector<2x1xf32>
    %c0_6 = arith.constant 0 : index
    %c0_7 = arith.constant 0 : index
    %10 = vector.load %arg7[%c0_6, %c0_7] : memref<2x1xf32, #tpu.memory_space<vmem>>, vector<2x1xf32>
    tpu.vector_store %arg7[%c0_6, %c0_7], %9 {strides = array<i32>} : memref<2x1xf32, #tpu.memory_space<vmem>>, vector<2x1xf32>,
    %11 = arith.addf %3, %4 : vector<2x1024xf32>
    %c0_8 = arith.constant 0 : index
    %c0_9 = arith.constant 0 : index
    %12 = vector.load %arg8[%c0_8, %c0_9] : memref<2x1xf32, #tpu.memory_space<vmem>>, vector<2x1xf32>
    %13 = arith.mulf %11, %11 : vector<2x1024xf32>
    %cst_10 = arith.constant dense<0.000000e+00> : vector<2xf32>
    %14 = vector.multi_reduction <add>, %13, %cst_10 [1] : vector<2x1024xf32> to vector<2xf32>
    %15 = vector.shape_cast %14 : vector<2xf32> to vector<2x1xf32>
    %16 = arith.addf %12, %15 : vector<2x1xf32>
    %c0_11 = arith.constant 0 : index
    %c0_12 = arith.constant 0 : index
    %17 = vector.load %arg8[%c0_11, %c0_12] : memref<2x1xf32, #tpu.memory_space<vmem>>, vector<2x1xf32>
    tpu.vector_store %arg8[%c0_11, %c0_12], %16 {strides = array<i32>} : memref<2x1xf32, #tpu.memory_space<vmem>>, vector<2x1xf32>,
    %c0_i32_13 = arith.constant 0 : i32
    %18 = arith.cmpi eq, %arg2, %c0_i32_13 : i32
    %19 = arith.extui %18 : i1 to i32
    %c0_i32_14 = arith.constant 0 : i32
    %20 = arith.cmpi ne, %19, %c0_i32_14 : i32
    scf.if %20 {
      %c0_15 = arith.constant 0 : index
      %c0_16 = arith.constant 0 : index
      %21 = vector.load %arg7[%c0_15, %c0_16] : memref<2x1xf32, #tpu.memory_space<vmem>>, vector<2x1xf32>
      %c0_17 = arith.constant 0 : index
      %c0_18 = arith.constant 0 : index
      %c0_19 = arith.constant 0 : index
      %22 = vector.load %arg5[%c0_17, %c0_18, %c0_19] : memref<1x2x1xf32, #tpu.memory_space<vmem>>, vector<1x2x1xf32>
      %23 = vector.shape_cast %22 : vector<1x2x1xf32> to vector<2x1xf32>
      %24 = vector.shape_cast %21 : vector<2x1xf32> to vector<1x2x1xf32>
      tpu.vector_store %arg5[%c0_17, %c0_18, %c0_19], %24 {strides = array<i32>} : memref<1x2x1xf32, #tpu.memory_space<vmem>>, vector<1x2x1xf32>,
      %c0_20 = arith.constant 0 : index
      %c0_21 = arith.constant 0 : index
      %25 = vector.load %arg8[%c0_20, %c0_21] : memref<2x1xf32, #tpu.memory_space<vmem>>, vector<2x1xf32>
      %c0_22 = arith.constant 0 : index
      %c0_23 = arith.constant 0 : index
      %26 = vector.load %arg7[%c0_22, %c0_23] : memref<2x1xf32, #tpu.memory_space<vmem>>, vector<2x1xf32>
      %cst_24 = arith.constant 2.000000e+00 : f32
      %27 = vector.broadcast %cst_24 : f32 to vector<2x1xf32>
      %28 = arith.mulf %27, %26 : vector<2x1xf32>
      %29 = arith.subf %25, %28 : vector<2x1xf32>
      %c0_25 = arith.constant 0 : index
      %c0_26 = arith.constant 0 : index
      %c0_27 = arith.constant 0 : index
      %30 = vector.load %arg6[%c0_25, %c0_26, %c0_27] : memref<1x2x1xf32, #tpu.memory_space<vmem>>, vector<1x2x1xf32>
      %31 = vector.shape_cast %30 : vector<1x2x1xf32> to vector<2x1xf32>
      %32 = vector.shape_cast %29 : vector<2x1xf32> to vector<1x2x1xf32>
      tpu.vector_store %arg6[%c0_25, %c0_26, %c0_27], %32 {strides = array<i32>} : memref<1x2x1xf32, #tpu.memory_space<vmem>>, vector<1x2x1xf32>,
    } else {
    }
    return
  }
  func.func @transform_0(%arg0: i32, %arg1: i32, %arg2: i32) -> (i32, i32) {
    %c1_i32 = arith.constant 1 : i32
    %0 = arith.muli %arg1, %c1_i32 : i32
    %1 = arith.addi %0, %arg2 : i32
    %c0_i32 = arith.constant 0 : i32
    %2 = arith.minsi %1, %c0_i32 : i32
    %c0_i32_0 = arith.constant 0 : i32
    return %arg0, %2 : i32, i32
  }
  func.func @transform_1(%arg0: i32, %arg1: i32, %arg2: i32) -> (i32, i32) {
    %c1_i32 = arith.constant 1 : i32
    %0 = arith.muli %arg1, %c1_i32 : i32
    %1 = arith.addi %0, %arg2 : i32
    %c0_i32 = arith.constant 0 : i32
    %2 = arith.minsi %1, %c0_i32 : i32
    %c0_i32_0 = arith.constant 0 : i32
    return %arg0, %2 : i32, i32
  }
  func.func @transform_2(%arg0: i32, %arg1: i32, %arg2: i32) -> (i32, i32, i32) {
    %c0_i32 = arith.constant 0 : i32
    %c0_i32_0 = arith.constant 0 : i32
    return %arg1, %arg0, %c0_i32 : i32, i32, i32
  }
  func.func @transform_3(%arg0: i32, %arg1: i32, %arg2: i32) -> (i32, i32, i32) {
    %c0_i32 = arith.constant 0 : i32
    %c0_i32_0 = arith.constant 0 : i32
    return %arg1, %arg0, %c0_i32 : i32, i32, i32
  }
}

</mosaic_0001>

<bundles_post_ra>
// kernel: tpu_custom_call.1
= control target key start
LH: loop header
LB: loop body
LE: loop exit
PB: predicated region body
PF: predicated region fallthrough
CT: control target
= control target key end

     0   :  { %9 = vsyncpa [#allocation5], 0  ;;  %s356_s0 = inlined_call_operand.hbm [shape: f32[2,1024], index: 0, kind: input, shape index: {}]   ;;  %s357_s1 = inlined_call_operand.hbm [shape: f32[2,1024], index: 1, kind: input, shape index: {}]   ;;  %s358_s2 = inlined_call_operand.vmem [shape: f32[1,2,1], index: 2, kind: output, shape index: {0}]   ;;  %s359_s3 = inlined_call_operand.vmem [shape: f32[1,2,1], index: 3, kind: output, shape index: {1}]  }
   0x1   :  { %10 = vsyncpa [#allocation7], 0  ;;  %s280_s12 = smov [#allocation4]   ;;  %s281_s14 = smov [#allocation6]  }
   0x2   :  { %s23_s13 = sshll.u32 %s280_s12, 4  ;;  %s39_s15 = sshll.u32 %s281_s14, 4  ;;  %s24_s13 = int_to_ptr.vmem [resolvable:$true] %s23_s13  ;;  %s40_s15 = int_to_ptr.vmem [resolvable:$true] %s39_s15 }
   0x3   :  { %s232_s18 = scalar_lea.hbm %s356_s0, 256 }
   0x4   :  { %p233_p0 = scmp.ne.s32.totalorder %s356_s0, %s232_s18  ;;  %p236_p1 = scmp.lt.u32.totalorder %s232_s18, %s356_s0 }
   0x6   :  { %p238_p2 = pnand %p236_p1, %p233_p0 }
   0x8   :  { %241 = shalt.err (!%p238_p2)
}
   0x9   :  { %s242_s23 = scalar_lea.vmem %s24_s13, 256  ;;  %p247_p4 = scmp.lt.s32.totalorder %s24_s13, %s24_s13 }
   0xa   :  { %p243_p3 = scmp.ne.s32.totalorder %s24_s13, %s242_s23  ;;  %p248_p5 = scmp.lt.s32.totalorder %s242_s23, %s242_s23 }
   0xc   :  { %p249_p6 = por %p248_p5, %p247_p4 }
   0xe   :  { %p250_p7 = pnand %p249_p6, %p243_p3 }
  0x10   :  { %253 = shalt.err (!%p250_p7)
}
  0x11   :  { %26 = dma.hbm_to_vmem [thread:$0]  %s356_s0, 256, %s24_s13, [#allocation5]  }
  0x12   :  { %s254_s28 = scalar_lea.hbm %s357_s1, 256 }
  0x13   :  { %p255_p8 = scmp.ne.s32.totalorder %s357_s1, %s254_s28  ;;  %p258_p9 = scmp.lt.u32.totalorder %s254_s28, %s357_s1 }
  0x15   :  { %p260_p10 = pnand %p258_p9, %p255_p8 }
  0x17   :  { %263 = shalt.err (!%p260_p10)
}
  0x18   :  { %s264_s6 = scalar_lea.vmem %s40_s15, 256  ;;  %p269_p12 = scmp.lt.s32.totalorder %s40_s15, %s40_s15 }
  0x19   :  { %p265_p11 = scmp.ne.s32.totalorder %s40_s15, %s264_s6  ;;  %p270_p13 = scmp.lt.s32.totalorder %s264_s6, %s264_s6 }
  0x1b   :  { %p271_p0 = por %p270_p13, %p269_p12 }
  0x1d   :  { %p272_p1 = pnand %p271_p0, %p265_p11 }
  0x1f   :  { %275 = shalt.err (!%p272_p1)
}
  0x20   :  { %42 = dma.hbm_to_vmem [thread:$0]  %s357_s1, 256, %s40_s15, [#allocation7]  }
  0x21   :  { %276 = dma.done.wait [#allocation5], 256  }
  0x22   :  { %277 = vsyncadd [#allocation5], 4294967040 }
  0x23   :  { %278 = dma.done.wait [#allocation7], 256  }
  0x24   :  { %279 = vsyncadd [#allocation7], 4294967040  ;;  %v77_v0 = vlaneseq  ;;  %vm61_vm0 = vcmask 1024   ;;  %v282_v1 = vmov 1983009808   ;;  %v283_v4 = vmov 0.0  }
  0x25   :  { %v75_v2 = vunpack.c.l.s4 %v282_v1  ;;  %62 = vst.msk [vmem:[#allocation2] sm:$0x3] %vm61_vm0, %v283_v4  ;;  %63 = vst.msk [vmem:[#allocation3] sm:$0x3] %vm61_vm0, %v283_v4  ;;  %v64_v7 = vld [vmem:[#allocation4] sm:$0xff]  ;;  %v65_v8 = vld [vmem:[#allocation4 + $0x8] sm:$0xff] }
  0x26   :  { %v78_v3 = vshrl.u32 %v77_v0, 7  ;;  %v66_v9 = vld [vmem:[#allocation6] sm:$0xff]  ;;  %v67_v10 = vld [vmem:[#allocation6 + $0x8] sm:$0xff]  ;;  %vm115_vm1 = vcmask 1041408  }
  0x27   :  { %v76_v5 = vunpack.c.0.s8 %v75_v2  ;;  %v69_v11 = vmul.f32 %v66_v9, %v64_v7  ;;  %v136_v12 = vadd.f32 %v66_v9, %v64_v7  ;;  %v70_v13 = vmul.f32 %v67_v10, %v65_v8 }
  0x28   :  { %v137_v14 = vadd.f32 %v67_v10, %v65_v8 }
  0x29   :  { %v79_v6 = vsub.s32 %v76_v5, %v78_v3  ;;  %v73_v15 = vcombine.high %v69_v11, %v69_v11  ;;  %v139_v17 = vmul.f32 %v136_v12, %v136_v12  ;;  %v90_v18 = vcombine.high %v70_v13, %v70_v13 }
  0x2a   :  { %v140_v24 = vmul.f32 %v137_v14, %v137_v14 }
  0x2b   :  { %v80_v16 = vrot.slane %v69_v11, %v79_v6  ;;  %v97_v19 = vrot.slane %v70_v13, %v79_v6  ;;  %v87_v20 = vrot.slane %v73_v15, %v79_v6  ;;  %v143_v23 = vcombine.high %v139_v17, %v139_v17 }
  0x2c   :  { %v150_v25 = vrot.slane %v139_v17, %v79_v6  ;;  %v104_v30 = vrot.slane %v90_v18, %v79_v6  ;;  %v160_v36 = vcombine.high %v140_v24, %v140_v24  ;;  %v167_v38 = vrot.slane %v140_v24, %v79_v6  ;;  %v68_v3 = vld [vmem:[#allocation2] sm:$0x3] }
  0x2d   :  { %v88_v21 = vcombine.high %v80_v16, %v80_v16  ;;  %v116_v22 = vsel %vm115_vm1, %v80_v16, 0.0  ;;  %v89_v26 = vcombine.high %v87_v20, %v87_v20  ;;  %v119_v28 = vsel %vm115_vm1, %v87_v20, 0.0 }
  0x2e   :  { %v157_v29 = vrot.slane %v143_v23, %v79_v6  ;;  %v105_v31 = vcombine.high %v97_v19, %v97_v19  ;;  %v158_v34 = vcombine.high %v150_v25, %v150_v25  ;;  %v185_v39 = vsel %vm115_vm1, %v150_v25, 0.0 }
  0x2f   :  { %v117_v27 = vsel %vm115_vm1, %v88_v21, 0.0  ;;  %v121_v33 = vsel %vm115_vm1, %v89_v26, 0.0  ;;  %v123_v40 = vsel %vm115_vm1, %v97_v19, 0.0  ;;  %v106_v43 = vcombine.high %v104_v30, %v104_v30 }
  0x30   :  { %v118_v32 = vadd.f32 %v117_v27, %v116_v22  ;;  %v159_v35 = vcombine.high %v157_v29, %v157_v29  ;;  %v186_v41 = vsel %vm115_vm1, %v158_v34, 0.0  ;;  %v188_v42 = vsel %vm115_vm1, %v157_v29, 0.0 }
  0x31   :  { %v187_v45 = vadd.f32 %v186_v41, %v185_v39  ;;  %v125_v46 = vsel %vm115_vm1, %v105_v31, 0.0  ;;  %v174_v47 = vrot.slane %v160_v36, %v79_v6  ;;  %v175_v48 = vcombine.high %v167_v38, %v167_v38  ;;  %v138_v6 = vld [vmem:[#allocation3] sm:$0x3] }
  0x32   :  { %v120_v37 = vadd.f32 %v119_v28, %v118_v32  ;;  %v190_v49 = vsel %vm115_vm1, %v159_v35, 0.0  ;;  %v127_v52 = vsel %vm115_vm1, %v104_v30, 0.0  ;;  %v192_v53 = vsel %vm115_vm1, %v167_v38, 0.0 }
  0x33   :  { %v189_v51 = vadd.f32 %v188_v42, %v187_v45  ;;  %v129_v56 = vsel %vm115_vm1, %v106_v43, 0.0  ;;  %v176_v57 = vcombine.high %v174_v47, %v174_v47  ;;  %v194_v58 = vsel %vm115_vm1, %v175_v48, 0.0 }
  0x34   :  { %v122_v44 = vadd.f32 %v121_v33, %v120_v37  ;;  %v196_v61 = vsel %vm115_vm1, %v174_v47, 0.0 }
  0x35   :  { %v191_v55 = vadd.f32 %v190_v49, %v189_v51  ;;  %v198_v0 = vsel %vm115_vm1, %v176_v57, 0.0 }
  0x36   :  { %v124_v50 = vadd.f32 %v123_v40, %v122_v44 }
  0x37   :  { %v193_v60 = vadd.f32 %v192_v53, %v191_v55 }
  0x38   :  { %v126_v54 = vadd.f32 %v125_v46, %v124_v50 }
  0x39   :  { %v195_v63 = vadd.f32 %v194_v58, %v193_v60 }
  0x3a   :  { %v128_v59 = vadd.f32 %v127_v52, %v126_v54 }
  0x3b   :  { %v197_v1 = vadd.f32 %v196_v61, %v195_v63 }
  0x3c   :  { %v130_v62 = vadd.f32 %v129_v56, %v128_v59 }
  0x3d   :  { %v199_v2 = vadd.f32 %v198_v0, %v197_v1 }
  0x3e   :  { %131 = vadd.xlane.f32.xlu0 %v130_v62 }
  0x42   :  { %200 = vadd.xlane.f32.xlu0 %v199_v2 }
  0xcb   :  { %v132_v4 = vpop.xlane.xlu0 %131 }
  0xcc   :  { %v133_v5 = vadd.f32 %v132_v4, %v68_v3 }
  0xce   :  { %135 = vst.msk [vmem:[#allocation2] sm:$0x3] %vm61_vm0, %v133_v5 }
  0xcf   :  { %v201_v7 = vpop.xlane.xlu0 %200 }
  0xd0   :  { %v202_v8 = vadd.f32 %v201_v7, %v138_v6 }
  0xd2   :  { %203 = vst.msk [vmem:[#allocation3] sm:$0x3] %vm61_vm0, %v202_v8 }
  0xd5   :  { %v207_v9 = vld [vmem:[#allocation2] sm:$0x3] }
  0xd6   :  { %v210_v10 = vld [vmem:[#allocation2] sm:$0x3]  ;;  %208 = vst.msk [vmem:[%s358_s2] sm:$0x3] %vm61_vm0, %v207_v9 }
  0xd7   :  { %v211_v11 = vmul.f32 2.0, %v210_v10 }
  0xd9   :  { %v209_v12 = vld [vmem:[#allocation3] sm:$0x3] }
  0xda   :  { %v212_v13 = vsub.f32 %v209_v12, %v211_v11 }
  0xdc   :  { %213 = vst.msk [vmem:[%s359_s3] sm:$0x3] %vm61_vm0, %v212_v13 }
  0xdd   :  { %222 = vsyncpa [#allocation5], 1 }
  0xde   :  { %223 = vsyncpa [#allocation7], 1 }

</bundles_post_ra>
